<compile_context>
chip_gen: v6e
topology: v6e:2x2x1
jax: 0.10.0
libtpu: 0.0.40
codegen_flags: <defaults>
</compile_context>

<pallas_src>
import jax
import jax.numpy as jnp
from jax.experimental import pallas as pl
from jax.experimental.pallas import tpu as pltpu


# ---------------------------------------------------------------------------
# Kernel: one batch tile (lanes) per grid step; weights/biases resident in VMEM.
# Everything is feature-major: activations are (features, TB).
# ---------------------------------------------------------------------------
def producer_kernel(xt_ref,                    # (K, TB)    bf16: concat(label, explain)^T
                    wj_ref, bj_ref,            # (H, K)  bf16 / (H, 1)   f32   joint layer
                    w1_ref, b1_ref,            # (H, H)  bf16 / (H, 1)   f32   net layer 1
                    w2_ref, b2_ref,            # (H, H)  bf16 / (H, 1)   f32   net layer 2
                    wf_ref, bf_ref,            # (OBS,H) bf16 / (OBS, 1) f32   final layer
                    out_ref):                  # (OBS, TB) bf16
    # JointLayer: z^T = tanh(Wj^T @ x^T + bj^T)          (f32 accum, f32 tanh)
    z = jnp.tanh(
        jnp.dot(wj_ref[...], xt_ref[...], preferred_element_type=jnp.float32)
        + bj_ref[...])
    # net: 2-layer MLP with ReLU (bf16 matmul operands, f32 accumulation)
    h = jnp.maximum(
        jnp.dot(w1_ref[...], z.astype(jnp.bfloat16),
                preferred_element_type=jnp.float32) + b1_ref[...], 0.0)
    h = jnp.maximum(
        jnp.dot(w2_ref[...], h.astype(jnp.bfloat16),
                preferred_element_type=jnp.float32) + b2_ref[...], 0.0)
    # final: ReLU (already applied above, idempotent) -> Linear -> sigmoid (obs_fn)
    o = jnp.dot(wf_ref[...], h.astype(jnp.bfloat16),
                preferred_element_type=jnp.float32) + bf_ref[...]
    out_ref[...] = jax.nn.sigmoid(o).astype(out_ref.dtype)


def _round_up(x, m):
    return (x + m - 1) // m * m


# ---------------------------------------------------------------------------
# Wrapper: transpose/concat/cast in plain XLA (tiny), launch batch-tiled
# pallas_call with batch as the lane axis, slice + transpose back.
# ---------------------------------------------------------------------------
def producer_forward(label, explain, params, *, tile_batch=512):
    batch = label.shape[0]
    k_in = label.shape[1] + explain.shape[1]
    hidden = params["w1"].shape[0]
    obs = params["wf"].shape[1]

    # Batch tile = lane dim -> multiple of 128.  Keep >= 2 grid steps whenever
    # batch > 128 so megacore ("parallel") sharding and DMA pipelining engage.
    half = _round_up(pl.cdiv(batch, 2), 128)
    TB = min(_round_up(max(tile_batch, 1), 128), half)
    B_P = _round_up(batch, TB)
    grid = (B_P // TB,)

    # Joint input, feature-major: (K, B_P) bf16.  Zero-padded batch columns are
    # sliced off after the kernel (no NaN risk: tanh/relu/sigmoid are finite).
    xt = jnp.concatenate([label, explain], axis=1).T.astype(jnp.bfloat16)
    xt = jnp.pad(xt, ((0, 0), (0, B_P - batch)))

    # Resident weights: pre-transposed, unpadded, bf16.  Biases as f32 columns.
    wj = jnp.concatenate([params["wl"], params["we"]], axis=0).T.astype(jnp.bfloat16)
    w1 = params["w1"].T.astype(jnp.bfloat16)
    w2 = params["w2"].T.astype(jnp.bfloat16)
    wf = params["wf"].T.astype(jnp.bfloat16)
    bj = params["bj"].T.astype(jnp.float32)   # (H, 1)
    b1 = params["b1"].T.astype(jnp.float32)
    b2 = params["b2"].T.astype(jnp.float32)
    bf = params["bf"].T.astype(jnp.float32)   # (OBS, 1)

    # Weights/biases: same block for every grid step -> stay resident in VMEM.
    def resident(shape):
        return pl.BlockSpec(shape, lambda i: (0, 0))

    out = pl.pallas_call(
        producer_kernel,
        out_shape=jax.ShapeDtypeStruct((obs, B_P), jnp.bfloat16),
        grid=grid,
        in_specs=[
            pl.BlockSpec((k_in, TB), lambda i: (0, i)),      # activations: batch-tiled
            resident((hidden, k_in)), resident((hidden, 1)),  # joint layer
            resident((hidden, hidden)), resident((hidden, 1)),  # net layer 1
            resident((hidden, hidden)), resident((hidden, 1)),  # net layer 2
            resident((obs, hidden)), resident((obs, 1)),        # final layer
        ],
        out_specs=pl.BlockSpec((obs, TB), lambda i: (0, i)),
        compiler_params=pltpu.CompilerParams(
            dimension_semantics=("parallel",),               # megacore sharding on v7x
        ),
    )(xt, wj, bj, w1, b1, w2, b2, wf, bf)

    # Slice off padded batch columns, back to (batch, obs), module-level f32.
    return out[:, :batch].T.astype(jnp.float32)


# ---------------------------------------------------------------------------
# Params + pure-JAX reference (matches kernel's bf16 weight/input rounding).
# ---------------------------------------------------------------------------
def init_params(key, label_size, explain_size, hidden_size, obs_size):
    """Deterministic xavier-uniform-like init (stand-in for init_weights)."""
    ks = jax.random.split(key, 5)

    def xavier(k, shape):
        fan_in, fan_out = shape
        lim = jnp.sqrt(6.0 / (fan_in + fan_out))
        return jax.random.uniform(k, shape, jnp.float32, -lim, lim)

    wj = xavier(ks[0], (label_size + explain_size, hidden_size))
    return {
        "wl": wj[:label_size, :],
        "we": wj[label_size:, :],
        "bj": jnp.zeros((1, hidden_size), jnp.float32),
        "w1": xavier(ks[1], (hidden_size, hidden_size)),
        "b1": jnp.zeros((1, hidden_size), jnp.float32),
        "w2": xavier(ks[2], (hidden_size, hidden_size)),
        "b2": jnp.zeros((1, hidden_size), jnp.float32),
        "wf": xavier(ks[3], (hidden_size, obs_size)),
        "bf": jnp.zeros((1, obs_size), jnp.float32),
    }


def producer_reference(label, explain, p):
    """f32 reference using the same bf16-rounded weights/inputs as the kernel."""
    def q(w):
        return w.astype(jnp.bfloat16).astype(jnp.float32)

    x = jnp.concatenate([label, explain], axis=1)
    x = x.astype(jnp.bfloat16).astype(jnp.float32)
    wj = jnp.concatenate([p["wl"], p["we"]], axis=0)
    z = jnp.tanh(x @ q(wj) + p["bj"])
    h = jnp.maximum(z @ q(p["w1"]) + p["b1"], 0.0)
    h = jnp.maximum(h @ q(p["w2"]) + p["b2"], 0.0)
    return jax.nn.sigmoid(h @ q(p["wf"]) + p["bf"])


if __name__ == "__main__":
    batch, label_size, explain_size, hidden_size, obs_size = 200, 10, 6, 32, 16

    key = jax.random.PRNGKey(0)
    k_lab, k_exp, k_par = jax.random.split(key, 3)
    label = jax.random.normal(k_lab, (batch, label_size), jnp.float32)
    explain = jax.random.normal(k_exp, (batch, explain_size), jnp.float32)
    params = init_params(k_par, label_size, explain_size, hidden_size, obs_size)

    # batch=200 -> TB=128, padded batch 256, grid=(2,): exercises the pipelined
    # grid and gives both v7x TensorCores a tile even at this small test size.
    out = producer_forward(label, explain, params)
    out = jax.block_until_ready(out)

    ref = producer_reference(label, explain, params)
    assert out.shape == (batch, obs_size)
    assert jnp.allclose(out, ref, atol=2e-2, rtol=2e-2), float(
        jnp.max(jnp.abs(out - ref)))

    print("KERNEL_OK")
</pallas_src>

<mosaic_0001>
module attributes {stable_mosaic.version = 11 : i64} {
  func.func @producer_kernel(%arg0: i32, %arg1: memref<16x128xbf16, #tpu.memory_space<vmem>>, %arg2: memref<32x16xbf16, #tpu.memory_space<vmem>>, %arg3: memref<32x1xf32, #tpu.memory_space<vmem>>, %arg4: memref<32x32xbf16, #tpu.memory_space<vmem>>, %arg5: memref<32x1xf32, #tpu.memory_space<vmem>>, %arg6: memref<32x32xbf16, #tpu.memory_space<vmem>>, %arg7: memref<32x1xf32, #tpu.memory_space<vmem>>, %arg8: memref<16x32xbf16, #tpu.memory_space<vmem>>, %arg9: memref<16x1xf32, #tpu.memory_space<vmem>>, %arg10: memref<16x128xbf16, #tpu.memory_space<vmem>>) attributes {dimension_semantics = [#tpu.dimension_semantics<parallel>], iteration_bounds = array<i64: 2>, scalar_prefetch = 0 : i64, scratch_operands = 0 : i64, tpu.core_type = #tpu.core_type<tc>, window_params = [{transform_indices = @transform_0, window_bounds = array<i64: 16, 128>}, {pipeline_mode = #tpu.pipeline_mode<synchronous>, transform_indices = @transform_1, window_bounds = array<i64: 32, 16>}, {pipeline_mode = #tpu.pipeline_mode<synchronous>, transform_indices = @transform_2, window_bounds = array<i64: 32, 1>}, {pipeline_mode = #tpu.pipeline_mode<synchronous>, transform_indices = @transform_3, window_bounds = array<i64: 32, 32>}, {pipeline_mode = #tpu.pipeline_mode<synchronous>, transform_indices = @transform_4, window_bounds = array<i64: 32, 1>}, {pipeline_mode = #tpu.pipeline_mode<synchronous>, transform_indices = @transform_5, window_bounds = array<i64: 32, 32>}, {pipeline_mode = #tpu.pipeline_mode<synchronous>, transform_indices = @transform_6, window_bounds = array<i64: 32, 1>}, {pipeline_mode = #tpu.pipeline_mode<synchronous>, transform_indices = @transform_7, window_bounds = array<i64: 16, 32>}, {pipeline_mode = #tpu.pipeline_mode<synchronous>, transform_indices = @transform_8, window_bounds = array<i64: 16, 1>}, {transform_indices = @transform_9, window_bounds = array<i64: 16, 128>}]} {
    %c0 = arith.constant 0 : index
    %c0_0 = arith.constant 0 : index
    %0 = vector.load %arg2[%c0, %c0_0] : memref<32x16xbf16, #tpu.memory_space<vmem>>, vector<32x16xbf16>
    %c0_1 = arith.constant 0 : index
    %c0_2 = arith.constant 0 : index
    %1 = vector.load %arg1[%c0_1, %c0_2] : memref<16x128xbf16, #tpu.memory_space<vmem>>, vector<16x128xbf16>
    %cst = arith.constant dense<0.000000e+00> : vector<32x128xf32>
    %2 = tpu.matmul %0, %1, %cst {dimension_numbers = #tpu.dot_dimension_numbers<[1], [0], [0], [1], [0, 0, 1, 1], [], []>} : vector<32x16xbf16>, vector<16x128xbf16>, vector<32x128xf32> -> vector<32x128xf32>
    %c0_3 = arith.constant 0 : index
    %c0_4 = arith.constant 0 : index
    %3 = vector.load %arg3[%c0_3, %c0_4] : memref<32x1xf32, #tpu.memory_space<vmem>>, vector<32x1xf32>
    %4 = vector.broadcast %3 : vector<32x1xf32> to vector<32x128xf32>
    %5 = arith.addf %2, %4 : vector<32x128xf32>
    %6 = math.tanh %5 : vector<32x128xf32>
    %c0_5 = arith.constant 0 : index
    %c0_6 = arith.constant 0 : index
    %7 = vector.load %arg4[%c0_5, %c0_6] : memref<32x32xbf16, #tpu.memory_space<vmem>>, vector<32x32xbf16>
    %8 = arith.truncf %6 : vector<32x128xf32> to vector<32x128xbf16>
    %cst_7 = arith.constant dense<0.000000e+00> : vector<32x128xf32>
    %9 = tpu.matmul %7, %8, %cst_7 {dimension_numbers = #tpu.dot_dimension_numbers<[1], [0], [0], [1], [0, 0, 1, 1], [], []>} : vector<32x32xbf16>, vector<32x128xbf16>, vector<32x128xf32> -> vector<32x128xf32>
    %c0_8 = arith.constant 0 : index
    %c0_9 = arith.constant 0 : index
    %10 = vector.load %arg5[%c0_8, %c0_9] : memref<32x1xf32, #tpu.memory_space<vmem>>, vector<32x1xf32>
    %11 = vector.broadcast %10 : vector<32x1xf32> to vector<32x128xf32>
    %12 = arith.addf %9, %11 : vector<32x128xf32>
    %cst_10 = arith.constant 0.000000e+00 : f32
    %13 = vector.broadcast %cst_10 : f32 to vector<32x128xf32>
    %14 = arith.maximumf %12, %13 : vector<32x128xf32>
    %c0_11 = arith.constant 0 : index
    %c0_12 = arith.constant 0 : index
    %15 = vector.load %arg6[%c0_11, %c0_12] : memref<32x32xbf16, #tpu.memory_space<vmem>>, vector<32x32xbf16>
    %16 = arith.truncf %14 : vector<32x128xf32> to vector<32x128xbf16>
    %cst_13 = arith.constant dense<0.000000e+00> : vector<32x128xf32>
    %17 = tpu.matmul %15, %16, %cst_13 {dimension_numbers = #tpu.dot_dimension_numbers<[1], [0], [0], [1], [0, 0, 1, 1], [], []>} : vector<32x32xbf16>, vector<32x128xbf16>, vector<32x128xf32> -> vector<32x128xf32>
    %c0_14 = arith.constant 0 : index
    %c0_15 = arith.constant 0 : index
    %18 = vector.load %arg7[%c0_14, %c0_15] : memref<32x1xf32, #tpu.memory_space<vmem>>, vector<32x1xf32>
    %19 = vector.broadcast %18 : vector<32x1xf32> to vector<32x128xf32>
    %20 = arith.addf %17, %19 : vector<32x128xf32>
    %cst_16 = arith.constant 0.000000e+00 : f32
    %21 = vector.broadcast %cst_16 : f32 to vector<32x128xf32>
    %22 = arith.maximumf %20, %21 : vector<32x128xf32>
    %c0_17 = arith.constant 0 : index
    %c0_18 = arith.constant 0 : index
    %23 = vector.load %arg8[%c0_17, %c0_18] : memref<16x32xbf16, #tpu.memory_space<vmem>>, vector<16x32xbf16>
    %24 = arith.truncf %22 : vector<32x128xf32> to vector<32x128xbf16>
    %cst_19 = arith.constant dense<0.000000e+00> : vector<16x128xf32>
    %25 = tpu.matmul %23, %24, %cst_19 {dimension_numbers = #tpu.dot_dimension_numbers<[1], [0], [0], [1], [0, 0, 1, 1], [], []>} : vector<16x32xbf16>, vector<32x128xbf16>, vector<16x128xf32> -> vector<16x128xf32>
    %c0_20 = arith.constant 0 : index
    %c0_21 = arith.constant 0 : index
    %26 = vector.load %arg9[%c0_20, %c0_21] : memref<16x1xf32, #tpu.memory_space<vmem>>, vector<16x1xf32>
    %27 = vector.broadcast %26 : vector<16x1xf32> to vector<16x128xf32>
    %28 = arith.addf %25, %27 : vector<16x128xf32>
    %29 = arith.negf %28 : vector<16x128xf32>
    %30 = math.exp %29 : vector<16x128xf32>
    %cst_22 = arith.constant 1.000000e+00 : f32
    %31 = vector.broadcast %cst_22 : f32 to vector<16x128xf32>
    %32 = arith.addf %31, %30 : vector<16x128xf32>
    %33 = arith.divf %31, %32 : vector<16x128xf32>
    %34 = arith.truncf %33 : vector<16x128xf32> to vector<16x128xbf16>
    %c0_23 = arith.constant 0 : index
    %c0_24 = arith.constant 0 : index
    %35 = vector.load %arg10[%c0_23, %c0_24] : memref<16x128xbf16, #tpu.memory_space<vmem>>, vector<16x128xbf16>
    tpu.vector_store %arg10[%c0_23, %c0_24], %34 {strides = array<i32>} : memref<16x128xbf16, #tpu.memory_space<vmem>>, vector<16x128xbf16>,
    return
  }
  func.func @transform_0(%arg0: i32) -> (i32, i32) {
    %c0_i32 = arith.constant 0 : i32
    %c0_i32_0 = arith.constant 0 : i32
    return %c0_i32, %arg0 : i32, i32
  }
  func.func @transform_1(%arg0: i32) -> (i32, i32) {
    %c0_i32 = arith.constant 0 : i32
    %c0_i32_0 = arith.constant 0 : i32
    %c0_i32_1 = arith.constant 0 : i32
    return %c0_i32, %c0_i32_0 : i32, i32
  }
  func.func @transform_2(%arg0: i32) -> (i32, i32) {
    %c0_i32 = arith.constant 0 : i32
    %c0_i32_0 = arith.constant 0 : i32
    %c0_i32_1 = arith.constant 0 : i32
    return %c0_i32, %c0_i32_0 : i32, i32
  }
  func.func @transform_3(%arg0: i32) -> (i32, i32) {
    %c0_i32 = arith.constant 0 : i32
    %c0_i32_0 = arith.constant 0 : i32
    %c0_i32_1 = arith.constant 0 : i32
    return %c0_i32, %c0_i32_0 : i32, i32
  }
  func.func @transform_4(%arg0: i32) -> (i32, i32) {
    %c0_i32 = arith.constant 0 : i32
    %c0_i32_0 = arith.constant 0 : i32
    %c0_i32_1 = arith.constant 0 : i32
    return %c0_i32, %c0_i32_0 : i32, i32
  }
  func.func @transform_5(%arg0: i32) -> (i32, i32) {
    %c0_i32 = arith.constant 0 : i32
    %c0_i32_0 = arith.constant 0 : i32
    %c0_i32_1 = arith.constant 0 : i32
    return %c0_i32, %c0_i32_0 : i32, i32
  }
  func.func @transform_6(%arg0: i32) -> (i32, i32) {
    %c0_i32 = arith.constant 0 : i32
    %c0_i32_0 = arith.constant 0 : i32
    %c0_i32_1 = arith.constant 0 : i32
    return %c0_i32, %c0_i32_0 : i32, i32
  }
  func.func @transform_7(%arg0: i32) -> (i32, i32) {
    %c0_i32 = arith.constant 0 : i32
    %c0_i32_0 = arith.constant 0 : i32
    %c0_i32_1 = arith.constant 0 : i32
    return %c0_i32, %c0_i32_0 : i32, i32
  }
  func.func @transform_8(%arg0: i32) -> (i32, i32) {
    %c0_i32 = arith.constant 0 : i32
    %c0_i32_0 = arith.constant 0 : i32
    %c0_i32_1 = arith.constant 0 : i32
    return %c0_i32, %c0_i32_0 : i32, i32
  }
  func.func @transform_9(%arg0: i32) -> (i32, i32) {
    %c0_i32 = arith.constant 0 : i32
    %c0_i32_0 = arith.constant 0 : i32
    return %c0_i32, %arg0 : i32, i32
  }
}

</mosaic_0001>

<bundles_post_ra>
// kernel: tpu_custom_call.1
= control target key start
LH: loop header
LB: loop body
LE: loop exit
PB: predicated region body
PF: predicated region fallthrough
CT: control target
= control target key end

     0   :  { %14 = vsyncpa [#allocation4], 0  ;;  %s1309_s0 = inlined_call_operand.vmem [shape: bf16[16,256], index: 0, kind: input, shape index: {}]   ;;  %s1310_s1 = inlined_call_operand.vmem [shape: bf16[32,16], index: 1, kind: input, shape index: {}]   ;;  %s1311_s2 = inlined_call_operand.vmem [shape: f32[32,1], index: 2, kind: input, shape index: {}]   ;;  %s1312_s3 = inlined_call_operand.vmem [shape: bf16[32,32], index: 3, kind: input, shape index: {}]   ;;  %s1313_s4 = inlined_call_operand.vmem [shape: f32[32,1], index: 4, kind: input, shape index: {}]   ;;  %s1314_s5 = inlined_call_operand.vmem [shape: bf16[32,32], index: 5, kind: input, shape index: {}]   ;;  %s1315_s6 = inlined_call_operand.vmem [shape: f32[32,1], index: 6, kind: input, shape index: {}]   ;;  %s1316_s7 = inlined_call_operand.vmem [shape: bf16[16,32], index: 7, kind: input, shape index: {}]   ;;  %s1317_s8 = inlined_call_operand.vmem [shape: f32[16,1], index: 8, kind: input, shape index: {}]   ;;  %s1318_s9 = inlined_call_operand.hbm [shape: bf16[16,256], index: 9, kind: output, shape index: {}]  }
   0x1   :  { %16 = vsyncpa [#allocation4 + $0x1], 0  ;;  %s1124_s30 = smov 0   ;;  %s1126_s10 = smov 0  }
   0x2   :  { %s1128_s11 = smov 0   ;;  %s1130_s12 = smov 0  }
   0x3 LB: > { %s851_s13 = sadd.s32 4294967295, %s1065_s12   ;;  %s852_s14 = sadd.s32 4294967294, %s1065_s12   ;;  %s1065_s12 = sphi %s1130_s12, %s1324_s12   ;;  %s1061_s11 = sphi %s1128_s11, %s1323_s11   ;;  %s1057_s10 = sphi %s1126_s10, %s1322_s10   ;;  %s1053_s30 = sphi %s1124_s30, %s1321_s30  }
   0x4   : > { %s1147_s15 = sadd.s32 1, %s1065_s12   ;;  %s29_s16 = sadd.s32 1, %s1061_s11 }
   0x5   : > { %s26_s17 = ssub.s32 %s1065_s12, %s1147_s15  ;;  %p36_p0 = scmp.ne.s32.totalorder %s1061_s11, %s1057_s10 }
   0x6   : > { %p27_p1 = scmp.eq.s32.totalorder %s26_s17, 0  ;;  %p37_p2 = scmp.eq.s32.totalorder %s1065_s12, 0 }
   0x7   : > { %p234_p3 = scmp.eq.s32.totalorder %s851_s13, 1  ;;  %p239_p4 = scmp.ne.s32.totalorder %s1057_s10, %s1053_s30 }
   0x8   : > { %s1160_s18 = scalar_select %p27_p1, %s1061_s11, %s29_s16  }
   0x9   : > { %p38_p5 = por %p37_p2, %p36_p0  ;;  %p1162_p6 = por %p234_p3, %p36_p0 }
   0xa   : > { %p240_p7 = scmp.eq.s32.totalorder %s852_s14, 1  ;;  %p854_p9 = scmp.ge.s32.totalorder %s1065_s12, 2 }
   0xc   : > { %p1166_p8 = por %p240_p7, %p239_p4  ;;  %280 = sbr.rel (%p854_p9) target bundleno = 22 (0x16), region = 48 }
  0x11   : > { %283 = sbr.rel (!%p38_p5) target bundleno = 22 (0x16), region = 52  ;;  %s285_s21 = sand.u32 (%p38_p5), 1, %s1061_s11  }
  0x12   : > { %s856_s22 = sshll.u32 (%p38_p5), %s1065_s12, 2  ;;  %s855_s23 = sshll.u32 (%p38_p5), %s285_s21, 3 }
  0x13   : > { %s289_s26 = scalar_lea.vmem (%p38_p5), %s1309_s0, %s856_s22  ;;  %s287_s27 = scalar_lea.vmem (%p38_p5), [#allocation2], %s855_s23 }
  0x14   : > { %v306_v0 = vld [vmem:[%s289_s26] sm:$0xf] (%p38_p5)  ;;  %v308_v1 = vld [vmem:[%s289_s26 + $0x8] sm:$0xf] (%p38_p5) }
  0x15   : > { %307 = vst [vmem:[%s287_s27] sm:$0xf] (%p38_p5), %v306_v0  ;;  %309 = vst [vmem:[%s287_s27 + $0x4] sm:$0xf] (%p38_p5), %v308_v1 }
  0x16 PF: > { %p857_p10 = scmp.ge.s32.totalorder %s1065_s12, 1  ;;  %p336_p11 = scmp.lt.s32.totalorder %s1065_s12, 3 }
  0x18   : > { %p337_p12 = pnand %p857_p10, %p336_p11 }
  0x19   : > { %s343_s28 = sand.u32 (!%p337_p12), 1, %s1057_s10   ;;  %s880_s23 = sshll.u32 (!%p337_p12), %s851_s13, 6 }
  0x1a   : > { %340 = sbr.rel (%p337_p12) target bundleno = 930 (0x3a2), region = 93  ;;  %s1186_s16 = sshll.u32 (!%p337_p12), %s343_s28, 3 }
  0x1b   : > { %s345_s22 = scalar_lea.vmem (!%p337_p12), [#allocation2], %s1186_s16  ;;  %s377_s21 = scalar_lea.vmem (!%p337_p12), [#allocation3], %s1186_s16 }
  0x1c   : > { %s1264_s26 = scalar_lea.hbm (!%p337_p12), %s1318_s9, %s880_s23  ;;  %s1268_s27 = scalar_lea.sflag (!%p337_p12), [#allocation4], %s343_s28 }
  0x1d   : > { %s1070_s13 = smov (!%p337_p12), [#allocation3]  }
  0x1e   : > { %s1009_s29 = sshll.u32 (!%p337_p12), %s1070_s13, 4  ;;  %s1010_s29 = int_to_ptr.vmem [resolvable:$false] %s1009_s29 }
  0x1f   : > { %v982_v2 = vld [vmem:[%s1310_s1] sm:$0xff]   ;;  %vm425_vm0 = vcmask 130048   ;;  %v387_v3 = vld [vmem:[%s1311_s2 + $0x10] sm:$0xff]  ;;  %v1067_v5 = vmov 0   ;;  %v983_v7 = vld [vmem:[%s1310_s1 + $0x8] sm:$0xff]   ;;  %vm525_vm1 = vcmask 261120  }
  0x20   : > { %906 = vmatprep.mubr.msk.bf16.mxu0 %vm425_vm0, %v982_v2  ;;  %v981_v4 = vld [vmem:[%s345_s22] sm:$0xff]   ;;  %979 = vset.pattern.permute.xlu0 %v1067_v5  ;;  %v388_v8 = vld [vmem:[%s1311_s2 + $0x18] sm:$0xff]  ;;  %v493_v10 = vld [vmem:[%s1313_s4 + $0x10] sm:$0xff]  ;;  %v1068_v60 = vmov 0.0   ;;  %vm1069_vm2 = vmmov 0   ;;  %s784_s22 = sshll.u32 %s377_s21, 4  ;;  %s1259_s22 = int_to_ptr.vmem [resolvable:$true] %s784_s22 }
  0x21   : > { %980 = vset.pattern.permute.xlu1 %v1067_v5  ;;  %401 = vperm.xlu0 %979, %v387_v3   ;;  %v385_v6 = vld [vmem:[%s1311_s2] sm:$0xff]  ;;  %v386_v9 = vld [vmem:[%s1311_s2 + $0x8] sm:$0xff]  ;;  %v494_v11 = vld [vmem:[%s1313_s4 + $0x18] sm:$0xff]  ;;  %s1005_s16 = scalar_lea.vmem %s1259_s22, 128  ;;  %s1011_s14 = scalar_lea.vmem %s1010_s29, 256 }
  0x22   : > { %904 = vmatprep.subr.bf16.mxu0 %v981_v4  ;;  %391 = vperm.xlu1 %980, %v385_v6   ;;  %v491_v12 = vld [vmem:[%s1313_s4] sm:$0xff]  ;;  %v492_v13 = vld [vmem:[%s1313_s4 + $0x8] sm:$0xff]  ;;  %v593_v14 = vld [vmem:[%s1315_s6 + $0x10] sm:$0xff]  ;;  %p1006_p13 = scmp.ne.s32.totalorder %s1259_s22, %s1005_s16  ;;  %p1012_p2 = scmp.lt.s32.totalorder %s1259_s22, %s1010_s29 }
  0x23   : > { %905 = vmatpush3.bf16.msra.mxu0 %v981_v4  ;;  %v594_v15 = vld [vmem:[%s1315_s6 + $0x18] sm:$0xff]  ;;  %v591_v16 = vld [vmem:[%s1315_s6] sm:$0xff]  ;;  %v592_v17 = vld [vmem:[%s1315_s6 + $0x8] sm:$0xff]  ;;  %p1013_p3 = scmp.lt.s32.totalorder %s1011_s14, %s1005_s16 }
  0x24   : > { %v688_v18 = vld [vmem:[%s1317_s8] sm:$0xff]  ;;  %v689_v19 = vld [vmem:[%s1317_s8 + $0x8] sm:$0xff]  ;;  %p1007_p0 = pnand %p1006_p13, %p1162_p6 }
  0x25   : > { %406 = vperm.xlu0 %979, %v388_v8   ;;  %v984_v20 = vld [vmem:[%s1312_s3] sm:$0xff]   ;;  %v985_v39 = vld [vmem:[%s1312_s3 + $0x8] sm:$0xff]   ;;  %p1014_p4 = por %p1013_p3, %p1012_p2 }
  0x26   : > { %907 = vmatmul.mubr.msk.bf16.vlgmr.msra.gmra.mxu0 %vm425_vm0, %v983_v7  ;;  %396 = vperm.xlu1 %980, %v386_v9   ;;  %v986_v40 = vld [vmem:[%s1314_s5] sm:$0xff]   ;;  %v987_v59 = vld [vmem:[%s1314_s5 + $0x8] sm:$0xff]   ;;  %p1008_p1 = pneg %p1007_p0 }
  0x27   : > { %914 = vmatprep.mubr.msk.bf16.mxu1 %vm525_vm1, %v984_v20  ;;  %922 = vmatprep.mubr.msk.bf16.mxu0 %vm525_vm1, %v986_v40 }
  0x28   : > { %p1015_p5 = pnand %p1014_p4, %p1008_p1 }
  0x29   : > { %507 = vperm.xlu0 %979, %v493_v10  }
  0x2a   : > { %512 = vperm.xlu1 %980, %v494_v11  }
  0x2d   : > { %497 = vperm.xlu0 %979, %v491_v12  }
  0x2e   : > { %502 = vperm.xlu1 %980, %v492_v13  }
  0x31   : > { %607 = vperm.xlu0 %979, %v593_v14  }
  0x32   : > { %612 = vperm.xlu1 %980, %v594_v15   ;;  %v988_v15 = vld [vmem:[%s1316_s7] sm:$0xff]  }
  0x35   : > { %597 = vperm.xlu0 %979, %v591_v16  }
  0x36   : > { %602 = vperm.xlu1 %980, %v592_v17  }
  0x39   : > { %692 = vperm.xlu0 %979, %v688_v18  }
  0x3a   : > { %697 = vperm.xlu1 %980, %v689_v19  }
  0x9c   : > { %v402_v21 = vpop.permute.xlu0 %401 }
  0x9d   : > { %v392_v22 = vpop.permute.xlu1 %391 }
  0xa0   : > { %v407_v26 = vpop.permute.xlu0 %406 }
  0xa1   : > { %v397_v30 = vpop.permute.xlu1 %396 }
  0xa4   : > { %v508_v41 = vpop.permute.xlu0 %507 }
  0xa5   : > { %v513_v42 = vpop.permute.xlu1 %512 }
  0xa8   : > { %v498_v46 = vpop.permute.xlu0 %497 }
  0xa9   : > { %v503_v50 = vpop.permute.xlu1 %502 }
  0xac   : > { %v608_v61 = vpop.permute.xlu0 %607 }
  0xad   : > { %v613_v62 = vpop.permute.xlu1 %612 }
  0xb0   : > { %v598_v3 = vpop.permute.xlu0 %597 }
  0xb1   : > { %v603_v5 = vpop.permute.xlu1 %602 }
  0xb4   : > { %v693_v16 = vpop.permute.xlu0 %692 }
  0xe6   : > { %v908_v23 = vpop.f32.mrf.mxu0 }
  0xe7   : > { %v475_v24 = vadd.f32 %v908_v23, %v402_v21  ;;  %v698_v21 = vpop.permute.xlu1 %697 }
  0xe8   : > { %v466_v25 = vpop.f32.mrf.mxu0 }
  0xe9   : > { %v467_v27 = vadd.f32 %v466_v25, %v392_v22  ;;  %989 = vtanh.f32 %v475_v24 }
  0xea   : > { %v909_v28 = vpop.f32.mrf.mxu0 }
  0xeb   : > { %v478_v29 = vadd.f32 %v909_v28, %v407_v26 }
  0xec   : > { %v469_v31 = vpop.f32.mrf.mxu0 }
  0xed   : > { %991 = vtanh.f32 %v478_v29  ;;  %v470_v32 = vadd.f32 %v469_v31, %v397_v30 }
  0xee   : > { %993 = vtanh.f32 %v467_v27 }
  0xef   : > { %995 = vtanh.f32 %v470_v32 }
  0xf6   : > { %v990_v33 = vpop.eup %989 }
  0xfa   : > { %v992_v34 = vpop.eup %991 }
  0xfb   : > { %v994_v35 = vpop.eup %993  ;;  %v490_v36 = vpack.c.bf16 %v992_v34, %v990_v33 }
  0xfc   : > { %v996_v37 = vpop.eup %995 }
  0xfd   : > { %910 = vmatprep.subr.bf16.mxu1 %v490_v36  ;;  %v489_v38 = vpack.c.bf16 %v996_v37, %v994_v35 }
  0xfe   : > { %911 = vmatpush3.bf16.msra.mxu1 %v490_v36 }
  0xff   : > { %912 = vmatprep.subr.bf16.mxu1 %v489_v38 }
 0x102   : > { %913 = vmatpush3.bf16.msra.mxu1 %v489_v38 }
 0x103   : > { %926 = vmatprep.subr.bf16.mxu1 %v1068_v60 }
 0x105   : > { %915 = vmatmul.mubr.msk.bf16.vlgmr.msra.gmra.mxu1 %vm525_vm1, %v985_v39 }
 0x106   : > { %930 = vmatprep.mubr.msk.bf16.mxu1 %vm1069_vm2, %v1068_v60 }
 0x1c5   : > { %v916_v43 = vpop.f32.mrf.mxu1 }
 0x1c6   : > { %v575_v45 = vadd.f32 %v916_v43, %v508_v41 }
 0x1c7   : > { %v566_v44 = vpop.f32.mrf.mxu1 }
 0x1c8   : > { %v567_v48 = vadd.f32 %v566_v44, %v498_v46  ;;  %v583_v52 = vmax.f32 %v575_v45, 0.0 }
 0x1c9   : > { %v917_v47 = vpop.f32.mrf.mxu1 }
 0x1ca   : > { %v578_v49 = vadd.f32 %v917_v47, %v513_v42  ;;  %v581_v55 = vmax.f32 %v567_v48, 0.0 }
 0x1cb   : > { %v569_v51 = vpop.f32.mrf.mxu1 }
 0x1cc   : > { %v584_v53 = vmax.f32 %v578_v49, 0.0  ;;  %v570_v54 = vadd.f32 %v569_v51, %v503_v50 }
 0x1ce   : > { %v590_v56 = vpack.c.bf16 %v584_v53, %v583_v52  ;;  %v582_v57 = vmax.f32 %v570_v54, 0.0 }
 0x1d0   : > { %v589_v58 = vpack.c.bf16 %v582_v57, %v581_v55  ;;  %918 = vmatprep.subr.bf16.mxu0 %v590_v56 }
 0x1d1   : > { %919 = vmatpush3.bf16.msra.mxu0 %v590_v56 }
 0x1d2   : > { %920 = vmatprep.subr.bf16.mxu0 %v589_v58 }
 0x1d5   : > { %921 = vmatpush3.bf16.msra.mxu0 %v589_v58 }
 0x1d8   : > { %923 = vmatmul.mubr.msk.bf16.vlgmr.msra.gmra.mxu0 %vm525_vm1, %v987_v59 }
 0x298   : > { %v924_v63 = vpop.f32.mrf.mxu0 }
 0x299   : > { %v674_v1 = vadd.f32 %v924_v63, %v608_v61 }
 0x29a   : > { %v665_v0 = vpop.f32.mrf.mxu0 }
 0x29b   : > { %v682_v7 = vmax.f32 %v674_v1, 0.0  ;;  %v666_v8 = vadd.f32 %v665_v0, %v598_v3 }
 0x29c   : > { %v925_v2 = vpop.f32.mrf.mxu0 }
 0x29d   : > { %v677_v4 = vadd.f32 %v925_v2, %v613_v62  ;;  %v680_v13 = vmax.f32 %v666_v8, 0.0 }
 0x29e   : > { %v668_v6 = vpop.f32.mrf.mxu0 }
 0x29f   : > { %v683_v9 = vmax.f32 %v677_v4, 0.0  ;;  %v669_v10 = vadd.f32 %v668_v6, %v603_v5 }
 0x2a1   : > { %v687_v11 = vpack.c.bf16 %v683_v9, %v682_v7  ;;  %v681_v12 = vmax.f32 %v669_v10, 0.0 }
 0x2a3   : > { %927 = vmatpush3.bf16.msra.mxu1 %v687_v11  ;;  %v686_v14 = vpack.c.bf16 %v681_v12, %v680_v13 }
 0x2a4   : > { %928 = vmatprep.subr.bf16.mxu1 %v1068_v60 }
 0x2a7   : > { %929 = vmatpush3.bf16.msra.mxu1 %v686_v14 }
 0x2aa   : > { %931 = vmatmul.mubr.msk.bf16.vlgmr.msra.gmra.mxu1 %vm525_vm1, %v988_v15 }
 0x36a   : > { %v742_v17 = vpop.f32.mrf.mxu1 }
 0x36b   : > { %v743_v18 = vadd.f32 %v742_v17, %v693_v16 }
 0x36c   : > { %v932_v19 = vpop.f32.mrf.mxu1 }
 0x36d   : > { %v875_v20 = vmul.f32 -1.442695, %v743_v18 }
 0x36e   : > { %v745_v22 = vpop.f32.mrf.mxu1 }
 0x36f   : > { %997 = vpow2.f32 %v875_v20  ;;  %v746_v23 = vadd.f32 %v745_v22, %v698_v21 }
 0x370   : > { %v933_v24 = vpop.f32.mrf.mxu1 }
 0x371   : > { %v876_v25 = vmul.f32 -1.442695, %v746_v23 }
 0x373   : > { %999 = vpow2.f32 %v876_v25 }
 0x37c   : > { %v998_v26 = vpop.eup %997 }
 0x37d   : > { %v755_v27 = vadd.f32 1.0, %v998_v26 }
 0x37f   : > { %1001 = vrcp.f32 %v755_v27 }
 0x380   : > { %v1000_v28 = vpop.eup %999 }
 0x381   : > { %v756_v29 = vadd.f32 1.0, %v1000_v28 }
 0x383   : > { %1003 = vrcp.f32 %v756_v29 }
 0x38c   : > { %v1002_v30 = vpop.eup %1001 }
 0x390   : > { %v1004_v31 = vpop.eup %1003 }
 0x391   : > { %v888_v32 = vpack.c.bf16 %v1004_v31, %v1002_v30 }
 0x393   : > { %889 = vst [vmem:[%s377_s21] sm:$0xff] %v888_v32  }
 0x394   : > { %1018 = shalt.err (!%p1015_p5)
}
 0x395   : > { %s1019_s28 = scalar_lea.hbm %s1264_s26, 128  ;;  %s1023_s23 = scalar_lea.hbm %s1318_s9, 256 }
 0x396   : > { %p1020_p7 = scmp.ne.s32.totalorder %s1264_s26, %s1019_s28  ;;  %p1024_p12 = scmp.lt.s32.totalorder %s1264_s26, %s1318_s9 }
 0x397   : > { %p1025_p13 = scmp.lt.s32.totalorder %s1023_s23, %s1019_s28 }
 0x398   : > { %p1021_p10 = pnand %p1020_p7, %p1162_p6 }
 0x399   : > { %p1026_p0 = por %p1025_p13, %p1024_p12 }
 0x39a   : > { %p1022_p11 = pneg %p1021_p10 }
 0x39c   : > { %p1027_p1 = pnand %p1026_p0, %p1022_p11 }
 0x39e   : > { %1030 = shalt.err (!%p1027_p1)
}
 0x39f   : > { %s1071_s16 = smov 64   ;;  %s1072_s13 = smov 128  }
 0x3a0   : > { %s1073_s29 = smov 4  }
 0x3a1   : > { %934 = dma.vmem_to_hbm [thread:$0]  (%p1162_p6), %s1259_s22, 128, %s1264_s26, %s1268_s27, %s1071_s16, %s1072_s13, %s1073_s29  }
 0x3a2 PF: > { %s799_s14 = sand.u32 1, %s1053_s30   ;;  %p937_p2 = pnand %p854_p9, %p1166_p8 }
 0x3a3   : > { %s800_s28 = scalar_lea.sflag [#allocation4], %s799_s14 }
 0x3a4   : > { %p938_p3 = pneg %p937_p2 }
 0x3a6   : > { %1048 = dma.done.wait (%p938_p3), %s800_s28, 128  }
 0x3a7   : > { %1050 = vsyncadd (%p938_p3), %s800_s28, 4294967168  ;;  %p19_p4 = scmp.ge.s32.totalorder %s1147_s15, 4   ;;  %s1321_s30 = smov %s1057_s10 }
 0x3a8   : > { %s1322_s10 = smov %s1061_s11  ;;  %s1323_s11 = smov %s1160_s18 }
 0x3a9   : > { %s1324_s12 = smov %s1147_s15  ;;  %21 = sbr.rel (!%p19_p4) target bundleno = 3 (0x3), region = 137 }
 0x3ae   :  { %805 = vsyncpa [#allocation4], 1 }
 0x3af   :  { %807 = vsyncpa [#allocation4 + $0x1], 1 }

</bundles_post_ra>
